<compile_context>
chip_gen: v5e
topology: v5e:2x2
jax: 0.10.0
libtpu: 0.0.40
codegen_flags: <defaults>
</compile_context>

<pallas_src>
import functools

import jax
import jax.numpy as jnp
from jax import lax
from jax.experimental import pallas as pl
from jax.experimental.pallas import tpu as pltpu


# ----------------------------- sizing helpers --------------------------------

_DEF_VMEM_CAP = 64 << 20  # conservative fallback = v7x per-TC VMEM


def _vmem_limit_bytes():
    """Per-kernel scoped-VMEM limit derived from the chip's physical VMEM."""
    cap = _DEF_VMEM_CAP
    try:
        cap = int(pltpu.get_tpu_info().vmem_capacity_bytes)
    except Exception:
        pass  # unknown chip: stay v7x-safe
    # 3/4 of physical, capped: v5e/v6e (128 MiB) -> 96 MiB, v7x (64 MiB) -> 48 MiB.
    return min((cap * 3) // 4, 100 << 20)


def _min_sublane(dtype):
    """Native sublane granularity for the dtype (8 f32 / 16 bf16 / 32 int8)."""
    return {4: 8, 2: 16, 1: 32}.get(jnp.dtype(dtype).itemsize, 8)


def _pick_lane_tile(total, target):
    """Largest multiple of 128 <= target dividing `total`, else `total`."""
    target = min(total, target)
    if total <= target:
        return total
    t = (target // 128) * 128
    while t >= 128:
        if total % t == 0:
            return t
        t -= 128
    return total  # full axis is always a legal block extent


def _pick_sublane_tile(total, target, min_sub):
    """Largest multiple of min_sub (falling back to 8) <= target dividing total."""
    target = min(total, target)
    for step in sorted({min_sub, 8}, reverse=True):
        t = (target // step) * step
        while t >= step:
            if total % t == 0:
                return t
            t -= step
    return total  # full axis is always a legal block extent


def _pick_batch_tile(n, row_bytes, budget_bytes):
    """Largest divisor of n fitting the per-buffer budget; >=2 tiles when n >= 16."""
    cap = max(1, budget_bytes // max(row_bytes, 1))
    target = min(n, cap)
    if n >= 16:            # leave >=2 parallel grid steps so both v7x TCs run
        target = min(target, n // 2)
    for t in range(max(target, 1), 0, -1):
        if n % t == 0:
            return t
    return 1
    # TODO(synk): column-tile kernel B as well when a single sample row
    # exceeds the per-buffer VMEM budget (very large C*H*W).


# -------------------------------- kernels ------------------------------------

def _stats_kernel(x_ref, o_ref, *, inv_group, eps, lc, n_chunks, unroll_g):
    # x_ref: (G, MFt, Lt)  -- one lane block of one row tile, all group members
    # o_ref: (1, MFt, 1) f32 -- resident accumulator across the reduction axis
    l = pl.program_id(2)
    G, MFt, _ = x_ref.shape

    @pl.when(l == 0)
    def _init():
        o_ref[...] = jnp.zeros_like(o_ref)

    def chunk_body(ci, acc):
        start = pl.multiple_of(ci * lc, lc)
        zero = jnp.zeros((MFt, lc), jnp.float32)

        # Pass 1: mean over the (small, static) group axis.
        s = lax.fori_loop(
            0, G,
            lambda g, a: a + x_ref[g, :, pl.ds(start, lc)].astype(jnp.float32),
            zero, unroll=unroll_g)
        mu = s * inv_group

        # Pass 2: mean over the group of squared deviations.
        def sq_body(g, a):
            d = x_ref[g, :, pl.ds(start, lc)].astype(jnp.float32) - mu
            return a + d * d

        ss = lax.fori_loop(0, G, sq_body, zero, unroll=unroll_g)
        sd = jnp.sqrt(ss * inv_group + eps)                  # (MFt, lc)
        return acc + jnp.sum(sd, axis=-1, keepdims=True)     # (MFt, 1)

    total = lax.fori_loop(0, n_chunks, chunk_body,
                          jnp.zeros((MFt, 1), jnp.float32),
                          unroll=(n_chunks <= 8))
    o_ref[...] += total[None]


def _concat_kernel(x_ref, s_ref, o_ref):
    # x_ref: (Nt, C, HW)   s_ref: (Nt, F, 1) f32   o_ref: (Nt, C+F, HW)
    C = x_ref.shape[1]
    o_ref[:, :C, :] = x_ref[...]
    s = s_ref[...].astype(o_ref.dtype)                       # (Nt, F, 1)
    o_ref[:, C:, :] = jnp.broadcast_to(
        s, (s.shape[0], s.shape[1], o_ref.shape[2]))


# -------------------------------- wrapper -------------------------------------

def minibatch_std_layer(x, group_size, num_channels=1):
    """x: (N, C, H, W) -> (N, C + num_channels, H, W), matching the torch module."""
    N, C, H, W = x.shape
    G = min(group_size, N) if group_size is not None else N
    F = num_channels
    assert N % G == 0, "batch size must be divisible by the group size"
    assert C % F == 0, "channels must be divisible by num_channels"
    c = C // F
    M = N // G
    HW = H * W
    cHW = c * HW
    MF = M * F
    itemsize = jnp.dtype(x.dtype).itemsize

    vmem_limit = _vmem_limit_bytes()
    block_budget = vmem_limit // 4     # per buffer copy; x2 for double-buffering
    min_sub = _min_sublane(x.dtype)

    # ---- kernel A: per-(m, f) std statistics -------------------------------
    # (G, M*F, c*H*W) is a pure view of the NCHW tensor (group dim outermost).
    xr = x.reshape(G, MF, cHW)

    # Row (sublane) tile: keep >=2 parallel row tiles when MF is big enough.
    mft_target = MF // 2 if MF >= 2 * min_sub else MF
    MFt = _pick_sublane_tile(MF, mft_target, min_sub)
    n_i = MF // MFt

    # Lane tile: as large as the VMEM budget allows (long DMA runs, few grid
    # steps).  When there is only one row tile, split the lane axis in two
    # parallel halves so both v7x TensorCores get work.
    max_lane = max(128, (block_budget // max(G * MFt * itemsize, 1)) // 128 * 128)
    lane_target = max_lane
    if n_i == 1 and cHW >= 256:
        lane_target = min(max_lane, max(128, cHW // 2))
    Lt = _pick_lane_tile(cHW, lane_target)
    n_l = cHW // Lt
    n_par = 2 if (n_i == 1 and n_l >= 2 and n_l % 2 == 0) else 1
    n_l_inner = n_l // n_par

    # Lane sub-chunk walked inside the kernel: keeps the ~4 live (MFt, lc)
    # f32 fori_loop temporaries well within the 64-vreg register file.
    lc = _pick_lane_tile(Lt, max(128, (8192 // max(MFt, 1)) // 128 * 128))
    n_chunks = Lt // lc

    def _x_map(i, h, l):
        return (0, i, h * n_l_inner + l)

    def _o_map(i, h, l):
        return (h, i, 0)

    partials = pl.pallas_call(
        functools.partial(_stats_kernel, inv_group=1.0 / G, eps=1e-8,
                          lc=lc, n_chunks=n_chunks, unroll_g=(G <= 16)),
        out_shape=jax.ShapeDtypeStruct((n_par, MF, 1), jnp.float32),
        grid=(n_i, n_par, n_l_inner),
        in_specs=[pl.BlockSpec((G, MFt, Lt), _x_map)],
        out_specs=pl.BlockSpec((1, MFt, 1), _o_map),
        compiler_params=pltpu.CompilerParams(
            dimension_semantics=("parallel", "parallel", "arbitrary"),
            vmem_limit_bytes=vmem_limit),
        cost_estimate=pl.CostEstimate(
            flops=6 * x.size,
            transcendentals=x.size // G,
            bytes_accessed=x.size * itemsize + n_par * MF * 4),
    )(xr)

    # Mean over c*H*W (single divide here) and map group-member stats onto the
    # batch: output row n gets the statistic of member n % M.  This is a tiny
    # (N, F, 1) float32 array -- never the broadcast (N, F, H, W) map.
    stats = partials.sum(axis=0) * (1.0 / cHW)                # (MF, 1)
    stats_n = jnp.tile(stats.reshape(M, F), (G, 1)).reshape(N, F, 1)

    # ---- kernel B: fused copy of x + std channels (replaces torch.cat) -----
    x3 = x.reshape(N, C, HW)
    row_bytes = (C * HW + (C + F) * HW) * itemsize + F * 4
    Nt = _pick_batch_tile(N, row_bytes, block_budget)

    out3 = pl.pallas_call(
        _concat_kernel,
        out_shape=jax.ShapeDtypeStruct((N, C + F, HW), x.dtype),
        grid=(N // Nt,),
        in_specs=[pl.BlockSpec((Nt, C, HW), lambda i: (i, 0, 0)),
                  pl.BlockSpec((Nt, F, 1), lambda i: (i, 0, 0))],
        out_specs=pl.BlockSpec((Nt, C + F, HW), lambda i: (i, 0, 0)),
        compiler_params=pltpu.CompilerParams(
            dimension_semantics=("parallel",),
            vmem_limit_bytes=vmem_limit),
        cost_estimate=pl.CostEstimate(
            flops=0, transcendentals=0,
            bytes_accessed=x.size * itemsize + N * F * 4
                           + N * (C + F) * HW * itemsize),
    )(x3, stats_n)

    return out3.reshape(N, C + F, H, W)


# ------------------------------- reference ------------------------------------

def _reference(x, group_size, num_channels=1):
    # pure-JAX reference mirroring the torch code, for a correctness check
    N, C, H, W = x.shape
    G = min(group_size, N) if group_size is not None else N
    F = num_channels
    c = C // F
    y = x.reshape(G, -1, F, c, H, W)
    y = y - y.mean(axis=0)
    y = jnp.mean(jnp.square(y), axis=0)
    y = jnp.sqrt(y + 1e-8)
    y = y.mean(axis=(2, 3, 4))
    y = y.reshape(-1, F, 1, 1)
    y = jnp.tile(y, (G, 1, H, W))
    return jnp.concatenate([x, y], axis=1)


if __name__ == "__main__":
    key = jax.random.PRNGKey(0)
    N, C, H, W = 2, 4, 16, 16
    group_size = 2      # G = min(2, N) = 2
    num_channels = 1    # F = 1

    x = jax.random.normal(key, (N, C, H, W), dtype=jnp.float32)

    out = minibatch_std_layer(x, group_size, num_channels)
    out = jax.block_until_ready(out)

    ref = _reference(x, group_size, num_channels)
    assert out.shape == (N, C + num_channels, H, W), out.shape
    assert jnp.allclose(out, ref, atol=1e-5, rtol=1e-5), float(
        jnp.max(jnp.abs(out - ref)))

    print("KERNEL_OK")
</pallas_src>

<mosaic_0001>
module attributes {stable_mosaic.version = 11 : i64} {
  func.func @_stats_kernel(%arg0: i32, %arg1: i32, %arg2: i32, %arg3: memref<2x1x512xf32, #tpu.memory_space<vmem>>, %arg4: memref<1x1x1xf32, #tpu.memory_space<vmem>>) attributes {dimension_semantics = [#tpu.dimension_semantics<parallel>, #tpu.dimension_semantics<parallel>, #tpu.dimension_semantics<arbitrary>], iteration_bounds = array<i64: 1, 2, 1>, scalar_prefetch = 0 : i64, scratch_operands = 0 : i64, tpu.core_type = #tpu.core_type<tc>, window_params = [{transform_indices = @transform_0, window_bounds = array<i64: 2, 1, 512>}, {transform_indices = @transform_1, window_bounds = array<i64: 1, 1, 1>}]} {
    %c0_i32 = arith.constant 0 : i32
    %0 = arith.cmpi eq, %arg2, %c0_i32 : i32
    %1 = arith.extui %0 : i1 to i32
    %c0_i32_0 = arith.constant 0 : i32
    %2 = arith.cmpi ne, %1, %c0_i32_0 : i32
    scf.if %2 {
      %cst_21 = arith.constant 0.000000e+00 : f32
      %45 = vector.broadcast %cst_21 : f32 to vector<1x1x1xf32>
      %c0_22 = arith.constant 0 : index
      %c0_23 = arith.constant 0 : index
      %c0_24 = arith.constant 0 : index
      %46 = vector.load %arg4[%c0_22, %c0_23, %c0_24] : memref<1x1x1xf32, #tpu.memory_space<vmem>>, vector<1x1x1xf32>
      tpu.vector_store %arg4[%c0_22, %c0_23, %c0_24], %45 {strides = array<i32>} : memref<1x1x1xf32, #tpu.memory_space<vmem>>, vector<1x1x1xf32>,
    } else {
    }
    %cst = arith.constant 0.000000e+00 : f32
    %3 = vector.broadcast %cst : f32 to vector<1x1xf32>
    %c0_i32_1 = arith.constant 0 : i32
    %c512_i32 = arith.constant 512 : i32
    %4 = arith.muli %c0_i32_1, %c512_i32 : i32
    %5 = tpu.assume_multiple %4, 512 : i32
    %cst_2 = arith.constant 0.000000e+00 : f32
    %6 = vector.broadcast %cst_2 : f32 to vector<1x512xf32>
    %c0_i32_3 = arith.constant 0 : i32
    %7 = arith.index_cast %c0_i32_3 : i32 to index
    %c0 = arith.constant 0 : index
    %8 = arith.index_cast %5 : i32 to index
    %9 = vector.load %arg3[%7, %c0, %8] : memref<2x1x512xf32, #tpu.memory_space<vmem>>, vector<1x1x512xf32>
    %10 = vector.shape_cast %9 : vector<1x1x512xf32> to vector<1x512xf32>
    %11 = arith.addf %6, %10 : vector<1x512xf32>
    %c1_i32 = arith.constant 1 : i32
    %12 = arith.index_cast %c1_i32 : i32 to index
    %c0_4 = arith.constant 0 : index
    %13 = arith.index_cast %5 : i32 to index
    %14 = vector.load %arg3[%12, %c0_4, %13] : memref<2x1x512xf32, #tpu.memory_space<vmem>>, vector<1x1x512xf32>
    %15 = vector.shape_cast %14 : vector<1x1x512xf32> to vector<1x512xf32>
    %16 = arith.addf %11, %15 : vector<1x512xf32>
    %c2_i32 = arith.constant 2 : i32
    %cst_5 = arith.constant 5.000000e-01 : f32
    %17 = vector.broadcast %cst_5 : f32 to vector<1x512xf32>
    %18 = arith.mulf %16, %17 : vector<1x512xf32>
    %c0_i32_6 = arith.constant 0 : i32
    %19 = arith.index_cast %c0_i32_6 : i32 to index
    %c0_7 = arith.constant 0 : index
    %20 = arith.index_cast %5 : i32 to index
    %21 = vector.load %arg3[%19, %c0_7, %20] : memref<2x1x512xf32, #tpu.memory_space<vmem>>, vector<1x1x512xf32>
    %22 = vector.shape_cast %21 : vector<1x1x512xf32> to vector<1x512xf32>
    %23 = arith.subf %22, %18 : vector<1x512xf32>
    %24 = arith.mulf %23, %23 : vector<1x512xf32>
    %25 = arith.addf %6, %24 : vector<1x512xf32>
    %c1_i32_8 = arith.constant 1 : i32
    %26 = arith.index_cast %c1_i32_8 : i32 to index
    %c0_9 = arith.constant 0 : index
    %27 = arith.index_cast %5 : i32 to index
    %28 = vector.load %arg3[%26, %c0_9, %27] : memref<2x1x512xf32, #tpu.memory_space<vmem>>, vector<1x1x512xf32>
    %29 = vector.shape_cast %28 : vector<1x1x512xf32> to vector<1x512xf32>
    %30 = arith.subf %29, %18 : vector<1x512xf32>
    %31 = arith.mulf %30, %30 : vector<1x512xf32>
    %32 = arith.addf %25, %31 : vector<1x512xf32>
    %c2_i32_10 = arith.constant 2 : i32
    %cst_11 = arith.constant 5.000000e-01 : f32
    %33 = vector.broadcast %cst_11 : f32 to vector<1x512xf32>
    %34 = arith.mulf %32, %33 : vector<1x512xf32>
    %cst_12 = arith.constant 9.99999993E-9 : f32
    %35 = vector.broadcast %cst_12 : f32 to vector<1x512xf32>
    %36 = arith.addf %34, %35 : vector<1x512xf32>
    %37 = math.sqrt %36 : vector<1x512xf32>
    %cst_13 = arith.constant dense<0.000000e+00> : vector<1xf32>
    %38 = vector.multi_reduction <add>, %37, %cst_13 [1] : vector<1x512xf32> to vector<1xf32>
    %39 = vector.shape_cast %38 : vector<1xf32> to vector<1x1xf32>
    %40 = arith.addf %3, %39 : vector<1x1xf32>
    %c1_i32_14 = arith.constant 1 : i32
    %c0_15 = arith.constant 0 : index
    %c0_16 = arith.constant 0 : index
    %c0_17 = arith.constant 0 : index
    %41 = vector.load %arg4[%c0_15, %c0_16, %c0_17] : memref<1x1x1xf32, #tpu.memory_space<vmem>>, vector<1x1x1xf32>
    %42 = vector.shape_cast %40 : vector<1x1xf32> to vector<1x1x1xf32>
    %43 = arith.addf %41, %42 : vector<1x1x1xf32>
    %c0_18 = arith.constant 0 : index
    %c0_19 = arith.constant 0 : index
    %c0_20 = arith.constant 0 : index
    %44 = vector.load %arg4[%c0_18, %c0_19, %c0_20] : memref<1x1x1xf32, #tpu.memory_space<vmem>>, vector<1x1x1xf32>
    tpu.vector_store %arg4[%c0_18, %c0_19, %c0_20], %43 {strides = array<i32>} : memref<1x1x1xf32, #tpu.memory_space<vmem>>, vector<1x1x1xf32>,
    return
  }
  func.func @transform_0(%arg0: i32, %arg1: i32, %arg2: i32) -> (i32, i32, i32) {
    %c1_i32 = arith.constant 1 : i32
    %0 = arith.muli %arg1, %c1_i32 : i32
    %1 = arith.addi %0, %arg2 : i32
    %c0_i32 = arith.constant 0 : i32
    %c0_i32_0 = arith.constant 0 : i32
    return %c0_i32, %arg0, %1 : i32, i32, i32
  }
  func.func @transform_1(%arg0: i32, %arg1: i32, %arg2: i32) -> (i32, i32, i32) {
    %c0_i32 = arith.constant 0 : i32
    %c0_i32_0 = arith.constant 0 : i32
    return %arg1, %arg0, %c0_i32 : i32, i32, i32
  }
}

</mosaic_0001>

<bundles_post_ra>
// kernel: tpu_custom_call.1
= control target key start
LH: loop header
LB: loop body
LE: loop exit
PB: predicated region body
PF: predicated region fallthrough
CT: control target
= control target key end

     0   :  { %6 = vsyncpa [#allocation3], 0  ;;  %s574_s0 = inlined_call_operand.hbm [shape: f32[2,1,1024], index: 0, kind: input, shape index: {}]   ;;  %s575_s1 = inlined_call_operand.vmem [shape: f32[2,1,1], index: 1, kind: output, shape index: {}]  }
   0x1   :  { %8 = vsyncpa [#allocation3 + $0x1], 0  ;;  %s479_s6 = smov 0   ;;  %s481_s7 = smov 0  }
   0x2   :  { %s483_s8 = smov 0   ;;  %s485_s9 = smov 0  }
   0x3   :  { %s487_s10 = smov 0   ;;  %s489_s11 = smov 0  }
   0x4 LB: > { %s311_s12 = sadd.s32 4294967295, %s463_s11   ;;  %s29_s13 = sadd.s32 1, %s459_s10  ;;  %s463_s11 = sphi %s489_s11, %s14_s11   ;;  %s459_s10 = sphi %s487_s10, %s582_s10   ;;  %s455_s9 = sphi %s485_s9, %s581_s9   ;;  %s451_s8 = sphi %s483_s8, %s580_s8   ;;  %s447_s7 = sphi %s481_s7, %s579_s7   ;;  %s443_s6 = sphi %s479_s6, %s578_s6  }
   0x5   : > { %p31_p0 = scmp.ge.s32.totalorder %s29_s13, 2  ;;  %s44_s14 = sadd.s32 1, %s451_s8 }
   0x6   : > { %p51_p1 = scmp.ne.s32.totalorder %s451_s8, %s447_s7  ;;  %p52_p2 = scmp.eq.s32.totalorder %s463_s11, 0 }
   0x7   : > { %s584_s13 = smov (%p31_p0, %s29_s13), 0  ;;  %p57_p4 = scmp.ne.s32.totalorder %s447_s7, %s443_s6 }
   0x8   : > { %p515_p3 = por %p52_p2, %p51_p1  ;;  %s40_s16 = ssub.s32 %s459_s10, %s584_s13 }
   0x9   : > { %p58_p5 = scmp.eq.s32.totalorder %s311_s12, 0  ;;  %p42_p6 = scmp.eq.s32.totalorder %s40_s16, 0 }
   0xa   : > { %p328_p8 = scmp.lt.s32.totalorder %s463_s11, 2  ;;  %s109_s19 = sand.u32 1, %s451_s8  }
   0xb   : > { %p522_p7 = por %p58_p5, %p57_p4  ;;  %s316_s20 = sshll.u32 %s459_s10, 2 }
   0xc   : > { %s528_s18 = scalar_select %p42_p6, %s451_s8, %s44_s14  }
   0xd   : > { %s315_s21 = sshll.u32 %s109_s19, 3  ;;  %s120_s24 = scalar_lea.hbm %s574_s0, %s316_s20 }
   0xe   : > { %s121_s25 = sshll.u32 %s120_s24, 4  ;;  %s113_s26 = scalar_lea.vmem [#allocation2], %s315_s21  ;;  %s122_s25 = int_to_ptr.hbm [resolvable:$true] %s121_s25 }
   0xf   : > { %s123_s27 = sshll.u32 %s113_s26, 4  ;;  %p325_p9 = pnand %p328_p8, %p515_p3  ;;  %s124_s27 = int_to_ptr.vmem [resolvable:$true] %s123_s27 }
  0x10   : > { %p317_p10 = scmp.ge.s32.totalorder %s463_s11, 1  ;;  %s110_s28 = scalar_lea.sflag [#allocation3], %s109_s19 }
  0x11   : > { %s465_s29 = smov 128   ;;  %s466_s30 = smov 64  }
  0x12   : > { %s467_s2 = smov 4   ;;  %p131_p11 = scmp.lt.s32.totalorder %s463_s11, 3 }
  0x13   : > { %327 = dma.hbm_to_vmem [thread:$0]  (!%p325_p9), %s122_s25, 128, %s124_s27, %s110_s28, %s465_s29, %s466_s30, %s467_s2  }
  0x14   : > { %p132_p12 = pnand %p317_p10, %p131_p11 }
  0x15   : > { %s137_s3 = sand.u32 (!%p132_p12), 1, %s447_s7  }
  0x16   : > { %135 = sbr.rel (%p132_p12) target bundleno = 192 (0xc0), region = 24  ;;  %s318_s4 = sshll.u32 (!%p132_p12), %s137_s3, 3 }
  0x17   : > { %s138_s5 = scalar_lea.sflag (!%p132_p12), [#allocation3], %s137_s3  ;;  %s141_s6 = scalar_lea.vmem (!%p132_p12), [#allocation2], %s318_s4 }
  0x1b   : > { %438 = dma.done.wait (%p522_p7), %s138_s5, 128  }
  0x1c   : > { %440 = vsyncadd (%p522_p7), %s138_s5, 4294967168  ;;  %v176_v0 = vld [vmem:[%s141_s6] sm:$0xf]  ;;  %v319_v1 = vld [vmem:[%s141_s6 + $0x4] sm:$0xf]  ;;  %p164_p13 = scmp.lt.s32.totalorder %s455_s9, 1 }
  0x1d   : > { %v181_v2 = vadd.f32 %v319_v1, %v176_v0  ;;  %vm174_vm0 = vcmask 0   ;;  %v468_v11 = vmov 0.0   ;;  %vm212_vm3 = vcmask 1040384  }
  0x1e   : > { %s586_s9 = smov (!%p164_p13, %s455_s9), 1 }
  0x1f   : > { %v182_v3 = vmul.f32 0.5, %v181_v2  ;;  %s549_s15 = scalar_lea.vmem %s575_s1, %s586_s9 }
  0x20   : > { %175 = vst.msk [vmem:[%s549_s15] sm:$0x1] %vm174_vm0, %v468_v11 }
  0x21   : > { %v183_v4 = vsub.f32 %v176_v0, %v182_v3  ;;  %v186_v5 = vsub.f32 %v319_v1, %v182_v3 }
  0x23   : > { %v184_v6 = vmul.f32 %v183_v4, %v183_v4  ;;  %v187_v7 = vmul.f32 %v186_v5, %v186_v5 }
  0x25   : > { %v188_v8 = vadd.f32 %v187_v7, %v184_v6 }
  0x27   : > { %v189_v9 = vmul.f32 0.5, %v188_v8  ;;  %v223_v33 = vld [vmem:[%s549_s15] sm:$0x1] }
  0x29   : > { %v190_v10 = vadd.f32 1e-08, %v189_v9 }
  0x2b   : > { %381 = vrsqrt.f32 %v190_v10  ;;  %vm198_vm1 = vcmp.eq.f32.partialorder %v190_v10, inf  ;;  %v201_v18 = vand.u32 2147483648, %v190_v10  ;;  %vm200_vm2 = vcmp.eq.f32.partialorder %v190_v10, 0.0 }
  0x31   : > { %v382_v12 = vpop.eup %381 }
  0x32   : > { %v192_v13 = vmul.f32 %v382_v12, %v190_v10 }
  0x34   : > { %v193_v14 = vmul.f32 %v382_v12, %v192_v13 }
  0x36   : > { %v194_v15 = vmul.f32 0.5, %v193_v14 }
  0x38   : > { %v195_v16 = vsub.f32 1.5, %v194_v15 }
  0x3a   : > { %v196_v17 = vmul.f32 %v382_v12, %v195_v16 }
  0x3c   : > { %v197_v19 = vmul.f32 %v196_v17, %v190_v10 }
  0x3e   : > { %v199_v20 = vsel %vm198_vm1, %v190_v10, %v197_v19 }
  0x3f   : > { %v202_v21 = vsel %vm200_vm2, %v201_v18, %v199_v20 }
  0x40   : > { %v204_v22 = vperm.slane %v202_v21, 0  ;;  %v205_v23 = vperm.slane %v202_v21, 1  ;;  %v206_v24 = vperm.slane %v202_v21, 2  ;;  %v207_v25 = vperm.slane %v202_v21, 3 }
  0x42   : > { %v213_v26 = vsel %vm212_vm3, %v204_v22, 0.0  ;;  %v214_v27 = vsel %vm212_vm3, %v205_v23, 0.0  ;;  %v216_v28 = vsel %vm212_vm3, %v206_v24, 0.0  ;;  %v218_v30 = vsel %vm212_vm3, %v207_v25, 0.0 }
  0x43   : > { %v215_v29 = vadd.f32 %v214_v27, %v213_v26 }
  0x45   : > { %v217_v31 = vadd.f32 %v216_v28, %v215_v29 }
  0x47   : > { %v219_v32 = vadd.f32 %v218_v30, %v217_v31 }
  0x49   : > { %220 = vadd.xlane.f32.xlu0 %v219_v32 }
  0xbc   : > { %v221_v34 = vpop.xlane.xlu0 %220 }
  0xbd   : > { %v224_v35 = vadd.f32 %v223_v33, %v221_v34 }
  0xbf   : > { %226 = vst.msk [vmem:[%s549_s15] sm:$0x1] %vm174_vm0, %v224_v35 }
  0xc0 PF: > { %s14_s11 = sadd.s32 1, %s463_s11   ;;  %s578_s6 = smov %s447_s7 }
  0xc1   : > { %p11_p0 = scmp.ge.s32.totalorder %s14_s11, 4   ;;  %s579_s7 = smov %s451_s8 }
  0xc2   : > { %s580_s8 = smov %s528_s18  ;;  %s581_s9 = smov %s459_s10 }
  0xc3   : > { %s582_s10 = smov %s584_s13  ;;  %13 = sbr.rel (!%p11_p0) target bundleno = 4 (0x4), region = 69 }
  0xc8   :  { %250 = vsyncpa [#allocation3], 1 }
  0xc9   :  { %252 = vsyncpa [#allocation3 + $0x1], 1 }

</bundles_post_ra>
